<compile_context>
chip_gen: v5e
topology: v5e:2x2
jax: 0.10.0
libtpu: 0.0.40
codegen_flags: <defaults>
</compile_context>

<pallas_src>
import functools

import jax
import jax.numpy as jnp
from jax.experimental import pallas as pl
from jax.experimental.pallas import tpu as pltpu

BN_EPS = 1e-5
NEG_FILL = -1.0e9
# Raise v5e's 16 MiB scoped-VMEM default; per-step footprints here stay well
# under 32 MiB even with the largest auto tiles (safe on v7x's 64 MiB too).
VMEM_LIMIT = 32 * 1024 * 1024


def _largest_divisor(n, cap):
    best = 1
    for d in range(1, max(1, min(n, cap)) + 1):
        if n % d == 0:
            best = d
    return best


def _pick_apply_rows(batch):
    """Batch rows per pass-2 block: prefer >=2 groups (megacore), then density."""
    if batch <= 1:
        return 1
    return _largest_divisor(batch, min(8, batch // 2))


def _pick_head_rows(batch, hw_pad, budget_bytes=4 * 1024 * 1024):
    """Batch rows per pass-3 (softmax) block under a per-step VMEM budget."""
    if batch <= 1:
        return 1
    cap = max(1, budget_bytes // (hw_pad * 4))
    return _largest_divisor(batch, min(cap, batch // 2))


# --------------------------------------------------------------------------
# Pass 1: per-batch channel moments (sums, squares, cross products)
# --------------------------------------------------------------------------
def _moments_kernel(x_ref, m_ref, s_ref, q_ref, c01_ref, c12_ref, c02_ref):
    """Accumulate lane-wise partial moments; one cross-lane reduce per batch row.

    x_ref : (3, TILE) channel-major tile (channels on sublanes, pixels on lanes)
    m_ref : (3, 3) resident per-batch output block (tile axis 'arbitrary')
            col 0 = sum(x_c), col 1 = sum(x_c^2),
            col 2 = [sum(x0*x1), sum(x1*x2), sum(x0*x2)]
    """
    i = pl.program_id(1)

    @pl.when(i == 0)
    def _():
        s_ref[...] = jnp.zeros_like(s_ref)
        q_ref[...] = jnp.zeros_like(q_ref)
        c01_ref[...] = jnp.zeros_like(c01_ref)
        c12_ref[...] = jnp.zeros_like(c12_ref)
        c02_ref[...] = jnp.zeros_like(c02_ref)

    x = x_ref[...]                                   # (3, TILE) f32
    x0 = x[0:1, :]
    x1 = x[1:2, :]
    x2 = x[2:3, :]
    s_ref[...] += x
    q_ref[...] += x * x
    c01_ref[...] += x0 * x1
    c12_ref[...] += x1 * x2
    c02_ref[...] += x0 * x2

    @pl.when(i == pl.num_programs(1) - 1)
    def _():
        m_ref[:, 0:1] = jnp.sum(s_ref[...], axis=1, keepdims=True)
        m_ref[:, 1:2] = jnp.sum(q_ref[...], axis=1, keepdims=True)
        m_ref[0:1, 2:3] = jnp.sum(c01_ref[...], axis=1, keepdims=True)
        m_ref[1:2, 2:3] = jnp.sum(c12_ref[...], axis=1, keepdims=True)
        m_ref[2:3, 2:3] = jnp.sum(c02_ref[...], axis=1, keepdims=True)


# --------------------------------------------------------------------------
# Pass 2: fused affine apply + actor mask + resident running max(f)
# --------------------------------------------------------------------------
def _make_apply_kernel(tile_n, hw, padded):
    """f = coef_f . x + off_f ; logits = wa*f + ba masked ; running max(f)."""

    def _apply_kernel(coef_ref, x_ref, logit_ref, fmax_ref):
        # coef_ref (SMEM, f32[6]) = [cf0, cf1, cf2, off_f, wa, ba]  (state order)
        i = pl.program_id(1)
        x = x_ref[...]                               # (bb, 3, TILE)
        x0 = x[:, 0, :]   # stock
        x1 = x[:, 1, :]   # bias_mask
        x2 = x[:, 2, :]   # mask
        # FilterCNN output (conv1+bn1+conv2+bn2 folded into one affine map).
        f = (coef_ref[0] * x0 + coef_ref[1] * x1 + coef_ref[2] * x2
             + coef_ref[3])                          # (bb, TILE)
        # actor 1x1 conv + masked_fill(mask == 0, -1e9)
        logit = coef_ref[4] * f + coef_ref[5]
        logit = jnp.where(x2 == 0.0, jnp.float32(NEG_FILL), logit)
        if padded:
            # Padded lanes -> -inf so the padded-row softmax in pass 3 is exact
            # and padded lanes never win the value max.
            lane = jax.lax.broadcasted_iota(jnp.int32, f.shape, 1)
            valid = i * tile_n + lane < hw
            logit = jnp.where(valid, logit, -jnp.inf)
            f_for_max = jnp.where(valid, f, -jnp.inf)
        else:
            f_for_max = f
        logit_ref[...] = logit                       # (bb, TILE) lane-dense store

        # Resident per-group running max of f (value head); tiny (1,128) block.
        @pl.when(i == 0)
        def _():
            fmax_ref[...] = jnp.full(fmax_ref.shape, -jnp.inf, jnp.float32)

        fmax_ref[...] = jnp.maximum(fmax_ref[...], jnp.max(f_for_max))

    return _apply_kernel


# --------------------------------------------------------------------------
# Pass 3: per-row softmax over the (padded) flattened spatial axis
# --------------------------------------------------------------------------
def _head_kernel(logit_ref, prob_ref):
    z = logit_ref[...]                               # (bh, hw_pad)
    zmax = jnp.max(z, axis=-1, keepdims=True)
    e = jnp.exp(z - zmax)
    s = jnp.sum(e, axis=-1, keepdims=True)
    r = pl.reciprocal(s, approx=True)                # EUP slot (nearly free)
    r = r * (2.0 - s * r)                            # one Newton step -> ~exact
    prob_ref[...] = e * r


# --------------------------------------------------------------------------
# Wrapper
# --------------------------------------------------------------------------
def actor_critic_forward(state, params, tile_n=None):
    """state: (B, 3, H, W) f32.  Returns (probs (B, H*W), value scalar)."""
    (W1, b1, g1, be1, w2, b2, g2, be2, wa, ba) = params
    B, C, H, W = state.shape
    assert C == 3
    HW = H * W

    # Auto-size the lane tile so each grid step moves ~1 MiB of input (amortizes
    # the ~0.35 us/step pipeline overhead) with near-zero padding waste.
    if tile_n is None:
        n_guess = max(1, -(-(12 * HW) // (1 << 20)))
        tile_n = -(-HW // n_guess)
    tile_n = max(128, ((int(tile_n) + 127) // 128) * 128)
    tile_n = min(tile_n, ((HW + 127) // 128) * 128)
    n_tiles = -(-HW // tile_n)
    hw_pad = n_tiles * tile_n
    padded = hw_pad != HW

    # Channel-major per batch: a free reshape, NO transpose copy.
    xr = state.astype(jnp.float32).reshape(B, 3, HW)
    if padded:
        xr = jnp.pad(xr, ((0, 0), (0, 0), (0, hw_pad - HW)))

    # ---------- pass 1: per-batch channel moments (batch axis 'parallel') ----
    moments = pl.pallas_call(
        _moments_kernel,
        out_shape=jax.ShapeDtypeStruct((B, 3, 3), jnp.float32),
        grid=(B, n_tiles),
        in_specs=[pl.BlockSpec((None, 3, tile_n), lambda b, i: (b, 0, i))],
        out_specs=pl.BlockSpec((None, 3, 3), lambda b, i: (b, 0, 0)),
        scratch_shapes=[pltpu.VMEM((3, tile_n), jnp.float32),
                        pltpu.VMEM((3, tile_n), jnp.float32),
                        pltpu.VMEM((1, tile_n), jnp.float32),
                        pltpu.VMEM((1, tile_n), jnp.float32),
                        pltpu.VMEM((1, tile_n), jnp.float32)],
        compiler_params=pltpu.CompilerParams(
            dimension_semantics=("parallel", "arbitrary"),
            vmem_limit_bytes=VMEM_LIMIT),
    )(xr)

    # ---------- tiny scalar algebra (O(10) flops): fold the whole network
    # (conv1 + bn1 + conv2 + bn2 + actor) into one per-pixel affine map.
    # BatchNorm training-mode stats are exact functions of these moments.
    # NOTE: variance via E[x^2]-E[x]^2 is cancellation-prone if |mean| >> std.
    # TODO(synk): switch to a centered two-pass / Welford combine of the
    # per-batch partials if inputs are strongly offset.
    n = jnp.float32(B * HW)                          # padded lanes contribute 0
    M = jnp.sum(moments, axis=0)                     # (3, 3) total moments
    Ex = M[:, 0] / n                                 # E[x], state channel order
    diag = M[:, 1] / n
    c01 = M[0, 2] / n
    c12 = M[1, 2] / n
    c02 = M[2, 2] / n
    Exx = jnp.stack([jnp.stack([diag[0], c01, c02]),
                     jnp.stack([c01, diag[1], c12]),
                     jnp.stack([c02, c12, diag[2]])])
    Cov = Exx - jnp.outer(Ex, Ex)

    # FilterCNN stacks [stock, mask, bias_mask]; state order is
    # [stock, bias_mask, mask] -> permute conv1 input columns, not the data.
    W1s = W1[:, jnp.array([0, 2, 1])]

    mean_h = W1s @ Ex + b1                           # conv1 output stats
    var_h = jnp.sum((W1s @ Cov) * W1s, axis=1)       # biased batch variance
    s1 = g1 / jnp.sqrt(var_h + BN_EPS)
    A1 = s1[:, None] * W1s                           # bn1(conv1(x)) = A1 x + c1
    c1 = s1 * (b1 - mean_h) + be1
    a2 = A1.T @ w2                                   # conv2: a2 . x + d2
    d2 = jnp.dot(w2, c1) + b2
    mean_y = jnp.dot(a2, Ex) + d2
    var_y = jnp.dot(a2, Cov @ a2)
    s2 = g2 / jnp.sqrt(var_y + BN_EPS)
    coef_f = s2 * a2                                 # f = coef_f . x + off_f
    off_f = s2 * (d2 - mean_y) + be2
    coefs = jnp.concatenate(
        [coef_f, jnp.stack([off_f, wa, ba])]).astype(jnp.float32)  # (6,) SMEM

    # ---------- pass 2: fused per-pixel affine + actor + mask + max(f) ------
    bb = _pick_apply_rows(B)                         # batch rows per block
    G = B // bb
    xr4 = xr.reshape(G, bb, 3, hw_pad)
    apply_kernel = _make_apply_kernel(tile_n, HW, padded)
    logits, fmax = pl.pallas_call(
        apply_kernel,
        out_shape=(jax.ShapeDtypeStruct((G, bb, hw_pad), jnp.float32),
                   jax.ShapeDtypeStruct((G, 1, 128), jnp.float32)),
        grid=(G, n_tiles),
        in_specs=[pl.BlockSpec(memory_space=pltpu.MemorySpace.SMEM),
                  pl.BlockSpec((None, bb, 3, tile_n),
                               lambda g, i: (g, 0, 0, i))],
        out_specs=[pl.BlockSpec((None, bb, tile_n), lambda g, i: (g, 0, i)),
                   pl.BlockSpec((None, 1, 128), lambda g, i: (g, 0, 0))],
        compiler_params=pltpu.CompilerParams(
            dimension_semantics=("parallel", "arbitrary"),
            vmem_limit_bytes=VMEM_LIMIT),
    )(coefs, xr4)

    # ---------- pass 3: per-batch-row softmax (padded logits fed directly) ---
    bh = _pick_head_rows(B, hw_pad)
    G3 = B // bh
    logits3 = logits.reshape(G3, bh, hw_pad)         # free leading-dim regroup
    probs = pl.pallas_call(
        _head_kernel,
        out_shape=jax.ShapeDtypeStruct((G3, bh, hw_pad), jnp.float32),
        grid=(G3,),
        in_specs=[pl.BlockSpec((None, bh, hw_pad), lambda g: (g, 0, 0))],
        out_specs=pl.BlockSpec((None, bh, hw_pad), lambda g: (g, 0, 0)),
        compiler_params=pltpu.CompilerParams(
            dimension_semantics=("parallel",),
            vmem_limit_bytes=VMEM_LIMIT),
    )(logits3)
    # TODO(synk): for extremely large H*W (> ~1M pixels per row) pass 3 should
    # switch to a tiled two-pass / streaming softmax instead of whole rows.

    probs = probs.reshape(B, hw_pad)
    if padded:
        probs = probs[:, :HW]                        # padded lanes hold prob 0

    value = jnp.max(fmax)                            # G tiny blocks -> scalar

    # TODO(synk): Categorical distribution object / Adam optimizer / checkpoint
    # I/O are not forward-pass math; probabilities + value are returned.
    return probs, value


def init_params(key, filter_out=3):
    """Deterministic init mirroring the PyTorch layer shapes (1x1 convs)."""
    k1, k2, k3, k4, k5, k6 = jax.random.split(key, 6)
    b_c1 = 1.0 / jnp.sqrt(3.0)                 # conv1 fan_in = 3
    b_c2 = 1.0 / jnp.sqrt(float(filter_out))   # conv2 fan_in = filter_out
    W1 = jax.random.uniform(k1, (filter_out, 3), jnp.float32, -b_c1, b_c1)
    b1 = jax.random.uniform(k2, (filter_out,), jnp.float32, -b_c1, b_c1)
    w2 = jax.random.uniform(k3, (filter_out,), jnp.float32, -b_c2, b_c2)
    b2 = jax.random.uniform(k4, (), jnp.float32, -b_c2, b_c2)
    wa = jax.random.uniform(k5, (), jnp.float32, -1.0, 1.0)  # actor fan_in = 1
    ba = jax.random.uniform(k6, (), jnp.float32, -1.0, 1.0)
    g1 = jnp.ones((filter_out,), jnp.float32)
    be1 = jnp.zeros((filter_out,), jnp.float32)
    g2 = jnp.ones((), jnp.float32)
    be2 = jnp.zeros((), jnp.float32)
    return (W1, b1, g1, be1, w2, b2, g2, be2, wa, ba)


def _reference_forward(state, params):
    """Pure-JAX replica of ActorCritic.forward (validates the moment refactor)."""
    (W1, b1, g1, be1, w2, b2, g2, be2, wa, ba) = params
    stock, bias_mask, mask = state[:, 0], state[:, 1], state[:, 2]
    x = jnp.stack([stock, mask, bias_mask], axis=1)          # (B,3,H,W)
    h = jnp.einsum('oc,bchw->bohw', W1, x) + b1[None, :, None, None]
    m1 = h.mean(axis=(0, 2, 3), keepdims=True)
    v1 = ((h - m1) ** 2).mean(axis=(0, 2, 3), keepdims=True)
    h = (h - m1) / jnp.sqrt(v1 + BN_EPS) * g1[None, :, None, None] \
        + be1[None, :, None, None]
    y = jnp.einsum('c,bchw->bhw', w2, h)[:, None] + b2        # (B,1,H,W)
    m2 = y.mean()
    v2 = ((y - m2) ** 2).mean()
    f = (y - m2) / jnp.sqrt(v2 + BN_EPS) * g2 + be2
    a = wa * f + ba
    a = jnp.where(mask[:, None] == 0, NEG_FILL, a)
    logits = a.reshape(a.shape[0], -1)
    probs = jax.nn.softmax(logits, axis=-1)
    value = jnp.max(f)
    return probs, value


if __name__ == "__main__":
    def build_state(key, B, H, W):
        ks, kb, km = jax.random.split(key, 3)
        stock = jax.random.normal(ks, (B, H, W), jnp.float32)
        bias_mask = jax.random.normal(kb, (B, H, W), jnp.float32)
        mask = (jax.random.uniform(km, (B, H, W)) > 0.5).astype(jnp.float32)
        return jnp.stack([stock, bias_mask, mask], axis=1)    # (B, 3, H, W)

    key = jax.random.PRNGKey(0)
    kin, kp = jax.random.split(key)
    params = init_params(kp, filter_out=3)

    # Case 1: multi-tile accumulation path (tile_n forced to 128 -> 2 tiles).
    # Case 2: auto tile size + multi-row (bb>1) apply / head blocks.
    # Case 3: spatial padding path (H*W not a multiple of 128).
    cases = [(2, 16, 16, 128), (4, 16, 16, None), (2, 9, 9, None)]

    for idx, (B, H, W, tn) in enumerate(cases):
        state = build_state(jax.random.fold_in(kin, idx), B, H, W)
        fwd = jax.jit(functools.partial(actor_critic_forward, tile_n=tn))
        probs, value = fwd(state, params)
        probs = jax.block_until_ready(probs)
        value = jax.block_until_ready(value)

        ref_probs, ref_value = _reference_forward(state, params)

        assert probs.shape == (B, H * W), probs.shape
        assert jnp.allclose(jnp.sum(probs, axis=-1), 1.0, atol=1e-4)
        assert jnp.allclose(probs, ref_probs, atol=5e-4, rtol=5e-3), \
            (idx, float(jnp.max(jnp.abs(probs - ref_probs))))
        assert jnp.allclose(value, ref_value, atol=5e-3, rtol=5e-3), \
            (idx, float(value), float(ref_value))

    print("KERNEL_OK")
</pallas_src>

<mosaic_0001>
module attributes {stable_mosaic.version = 11 : i64} {
  func.func @_moments_kernel(%arg0: i32, %arg1: i32, %arg2: memref<1x3x128xf32, #tpu.memory_space<vmem>>, %arg3: memref<1x3x3xf32, #tpu.memory_space<vmem>>, %arg4: memref<3x128xf32, #tpu.memory_space<vmem>>, %arg5: memref<3x128xf32, #tpu.memory_space<vmem>>, %arg6: memref<1x128xf32, #tpu.memory_space<vmem>>, %arg7: memref<1x128xf32, #tpu.memory_space<vmem>>, %arg8: memref<1x128xf32, #tpu.memory_space<vmem>>) attributes {dimension_semantics = [#tpu.dimension_semantics<parallel>, #tpu.dimension_semantics<arbitrary>], iteration_bounds = array<i64: 2, 2>, scalar_prefetch = 0 : i64, scratch_operands = 5 : i64, tpu.core_type = #tpu.core_type<tc>, window_params = [{transform_indices = @transform_0, window_bounds = array<i64: 1, 3, 128>}, {transform_indices = @transform_1, window_bounds = array<i64: 1, 3, 3>}]} {
    %c0_i32 = arith.constant 0 : i32
    %0 = arith.cmpi eq, %arg1, %c0_i32 : i32
    %1 = arith.extui %0 : i1 to i32
    %c0_i32_0 = arith.constant 0 : i32
    %2 = arith.cmpi ne, %1, %c0_i32_0 : i32
    scf.if %2 {
      %cst = arith.constant 0.000000e+00 : f32
      %30 = vector.broadcast %cst : f32 to vector<3x128xf32>
      %c0_24 = arith.constant 0 : index
      %c0_25 = arith.constant 0 : index
      %31 = vector.load %arg4[%c0_24, %c0_25] : memref<3x128xf32, #tpu.memory_space<vmem>>, vector<3x128xf32>
      tpu.vector_store %arg4[%c0_24, %c0_25], %30 {strides = array<i32>} : memref<3x128xf32, #tpu.memory_space<vmem>>, vector<3x128xf32>,
      %cst_26 = arith.constant 0.000000e+00 : f32
      %32 = vector.broadcast %cst_26 : f32 to vector<3x128xf32>
      %c0_27 = arith.constant 0 : index
      %c0_28 = arith.constant 0 : index
      %33 = vector.load %arg5[%c0_27, %c0_28] : memref<3x128xf32, #tpu.memory_space<vmem>>, vector<3x128xf32>
      tpu.vector_store %arg5[%c0_27, %c0_28], %32 {strides = array<i32>} : memref<3x128xf32, #tpu.memory_space<vmem>>, vector<3x128xf32>,
      %cst_29 = arith.constant 0.000000e+00 : f32
      %34 = vector.broadcast %cst_29 : f32 to vector<1x128xf32>
      %c0_30 = arith.constant 0 : index
      %c0_31 = arith.constant 0 : index
      %35 = vector.load %arg6[%c0_30, %c0_31] : memref<1x128xf32, #tpu.memory_space<vmem>>, vector<1x128xf32>
      tpu.vector_store %arg6[%c0_30, %c0_31], %34 {strides = array<i32>} : memref<1x128xf32, #tpu.memory_space<vmem>>, vector<1x128xf32>,
      %cst_32 = arith.constant 0.000000e+00 : f32
      %36 = vector.broadcast %cst_32 : f32 to vector<1x128xf32>
      %c0_33 = arith.constant 0 : index
      %c0_34 = arith.constant 0 : index
      %37 = vector.load %arg7[%c0_33, %c0_34] : memref<1x128xf32, #tpu.memory_space<vmem>>, vector<1x128xf32>
      tpu.vector_store %arg7[%c0_33, %c0_34], %36 {strides = array<i32>} : memref<1x128xf32, #tpu.memory_space<vmem>>, vector<1x128xf32>,
      %cst_35 = arith.constant 0.000000e+00 : f32
      %38 = vector.broadcast %cst_35 : f32 to vector<1x128xf32>
      %c0_36 = arith.constant 0 : index
      %c0_37 = arith.constant 0 : index
      %39 = vector.load %arg8[%c0_36, %c0_37] : memref<1x128xf32, #tpu.memory_space<vmem>>, vector<1x128xf32>
      tpu.vector_store %arg8[%c0_36, %c0_37], %38 {strides = array<i32>} : memref<1x128xf32, #tpu.memory_space<vmem>>, vector<1x128xf32>,
    } else {
    }
    %c0 = arith.constant 0 : index
    %c0_1 = arith.constant 0 : index
    %c0_2 = arith.constant 0 : index
    %3 = vector.load %arg2[%c0, %c0_1, %c0_2] : memref<1x3x128xf32, #tpu.memory_space<vmem>>, vector<1x3x128xf32>
    %4 = vector.shape_cast %3 : vector<1x3x128xf32> to vector<3x128xf32>
    %5 = vector.extract_strided_slice %4 {offsets = [0, 0], sizes = [1, 128], strides = [1, 1]} : vector<3x128xf32> to vector<1x128xf32>
    %6 = vector.extract_strided_slice %4 {offsets = [1, 0], sizes = [1, 128], strides = [1, 1]} : vector<3x128xf32> to vector<1x128xf32>
    %7 = vector.extract_strided_slice %4 {offsets = [2, 0], sizes = [1, 128], strides = [1, 1]} : vector<3x128xf32> to vector<1x128xf32>
    %c0_3 = arith.constant 0 : index
    %c0_4 = arith.constant 0 : index
    %8 = vector.load %arg4[%c0_3, %c0_4] : memref<3x128xf32, #tpu.memory_space<vmem>>, vector<3x128xf32>
    %9 = arith.addf %8, %4 : vector<3x128xf32>
    %c0_5 = arith.constant 0 : index
    %c0_6 = arith.constant 0 : index
    %10 = vector.load %arg4[%c0_5, %c0_6] : memref<3x128xf32, #tpu.memory_space<vmem>>, vector<3x128xf32>
    tpu.vector_store %arg4[%c0_5, %c0_6], %9 {strides = array<i32>} : memref<3x128xf32, #tpu.memory_space<vmem>>, vector<3x128xf32>,
    %c0_7 = arith.constant 0 : index
    %c0_8 = arith.constant 0 : index
    %11 = vector.load %arg5[%c0_7, %c0_8] : memref<3x128xf32, #tpu.memory_space<vmem>>, vector<3x128xf32>
    %12 = arith.mulf %4, %4 : vector<3x128xf32>
    %13 = arith.addf %11, %12 : vector<3x128xf32>
    %c0_9 = arith.constant 0 : index
    %c0_10 = arith.constant 0 : index
    %14 = vector.load %arg5[%c0_9, %c0_10] : memref<3x128xf32, #tpu.memory_space<vmem>>, vector<3x128xf32>
    tpu.vector_store %arg5[%c0_9, %c0_10], %13 {strides = array<i32>} : memref<3x128xf32, #tpu.memory_space<vmem>>, vector<3x128xf32>,
    %c0_11 = arith.constant 0 : index
    %c0_12 = arith.constant 0 : index
    %15 = vector.load %arg6[%c0_11, %c0_12] : memref<1x128xf32, #tpu.memory_space<vmem>>, vector<1x128xf32>
    %16 = arith.mulf %5, %6 : vector<1x128xf32>
    %17 = arith.addf %15, %16 : vector<1x128xf32>
    %c0_13 = arith.constant 0 : index
    %c0_14 = arith.constant 0 : index
    %18 = vector.load %arg6[%c0_13, %c0_14] : memref<1x128xf32, #tpu.memory_space<vmem>>, vector<1x128xf32>
    tpu.vector_store %arg6[%c0_13, %c0_14], %17 {strides = array<i32>} : memref<1x128xf32, #tpu.memory_space<vmem>>, vector<1x128xf32>,
    %c0_15 = arith.constant 0 : index
    %c0_16 = arith.constant 0 : index
    %19 = vector.load %arg7[%c0_15, %c0_16] : memref<1x128xf32, #tpu.memory_space<vmem>>, vector<1x128xf32>
    %20 = arith.mulf %6, %7 : vector<1x128xf32>
    %21 = arith.addf %19, %20 : vector<1x128xf32>
    %c0_17 = arith.constant 0 : index
    %c0_18 = arith.constant 0 : index
    %22 = vector.load %arg7[%c0_17, %c0_18] : memref<1x128xf32, #tpu.memory_space<vmem>>, vector<1x128xf32>
    tpu.vector_store %arg7[%c0_17, %c0_18], %21 {strides = array<i32>} : memref<1x128xf32, #tpu.memory_space<vmem>>, vector<1x128xf32>,
    %c0_19 = arith.constant 0 : index
    %c0_20 = arith.constant 0 : index
    %23 = vector.load %arg8[%c0_19, %c0_20] : memref<1x128xf32, #tpu.memory_space<vmem>>, vector<1x128xf32>
    %24 = arith.mulf %5, %7 : vector<1x128xf32>
    %25 = arith.addf %23, %24 : vector<1x128xf32>
    %c0_21 = arith.constant 0 : index
    %c0_22 = arith.constant 0 : index
    %26 = vector.load %arg8[%c0_21, %c0_22] : memref<1x128xf32, #tpu.memory_space<vmem>>, vector<1x128xf32>
    tpu.vector_store %arg8[%c0_21, %c0_22], %25 {strides = array<i32>} : memref<1x128xf32, #tpu.memory_space<vmem>>, vector<1x128xf32>,
    %c1_i32 = arith.constant 1 : i32
    %27 = arith.cmpi eq, %arg1, %c1_i32 : i32
    %28 = arith.extui %27 : i1 to i32
    %c0_i32_23 = arith.constant 0 : i32
    %29 = arith.cmpi ne, %28, %c0_i32_23 : i32
    scf.if %29 {
      %c0_24 = arith.constant 0 : index
      %c0_25 = arith.constant 0 : index
      %30 = vector.load %arg4[%c0_24, %c0_25] : memref<3x128xf32, #tpu.memory_space<vmem>>, vector<3x128xf32>
      %cst = arith.constant dense<0.000000e+00> : vector<3xf32>
      %31 = vector.multi_reduction <add>, %30, %cst [1] : vector<3x128xf32> to vector<3xf32>
      %32 = vector.shape_cast %31 : vector<3xf32> to vector<3x1xf32>
      %c0_26 = arith.constant 0 : index
      %c0_27 = arith.constant 0 : index
      %c0_28 = arith.constant 0 : index
      %33 = vector.load %arg3[%c0_26, %c0_27, %c0_28] : memref<1x3x3xf32, #tpu.memory_space<vmem>>, vector<1x3x1xf32>
      %34 = vector.shape_cast %33 : vector<1x3x1xf32> to vector<3x1xf32>
      %35 = vector.shape_cast %32 : vector<3x1xf32> to vector<1x3x1xf32>
      tpu.vector_store %arg3[%c0_26, %c0_27, %c0_28], %35 {strides = array<i32>} : memref<1x3x3xf32, #tpu.memory_space<vmem>>, vector<1x3x1xf32>,
      %c0_29 = arith.constant 0 : index
      %c0_30 = arith.constant 0 : index
      %36 = vector.load %arg5[%c0_29, %c0_30] : memref<3x128xf32, #tpu.memory_space<vmem>>, vector<3x128xf32>
      %cst_31 = arith.constant dense<0.000000e+00> : vector<3xf32>
      %37 = vector.multi_reduction <add>, %36, %cst_31 [1] : vector<3x128xf32> to vector<3xf32>
      %38 = vector.shape_cast %37 : vector<3xf32> to vector<3x1xf32>
      %c0_32 = arith.constant 0 : index
      %c0_33 = arith.constant 0 : index
      %c1 = arith.constant 1 : index
      %39 = vector.load %arg3[%c0_32, %c0_33, %c1] : memref<1x3x3xf32, #tpu.memory_space<vmem>>, vector<1x3x1xf32>
      %40 = vector.shape_cast %39 : vector<1x3x1xf32> to vector<3x1xf32>
      %41 = vector.shape_cast %38 : vector<3x1xf32> to vector<1x3x1xf32>
      tpu.vector_store %arg3[%c0_32, %c0_33, %c1], %41 {strides = array<i32>} : memref<1x3x3xf32, #tpu.memory_space<vmem>>, vector<1x3x1xf32>,
      %c0_34 = arith.constant 0 : index
      %c0_35 = arith.constant 0 : index
      %42 = vector.load %arg6[%c0_34, %c0_35] : memref<1x128xf32, #tpu.memory_space<vmem>>, vector<1x128xf32>
      %cst_36 = arith.constant dense<0.000000e+00> : vector<1xf32>
      %43 = vector.multi_reduction <add>, %42, %cst_36 [1] : vector<1x128xf32> to vector<1xf32>
      %44 = vector.shape_cast %43 : vector<1xf32> to vector<1x1xf32>
      %c0_37 = arith.constant 0 : index
      %c0_38 = arith.constant 0 : index
      %c2 = arith.constant 2 : index
      %45 = vector.load %arg3[%c0_37, %c0_38, %c2] : memref<1x3x3xf32, #tpu.memory_space<vmem>>, vector<1x1x1xf32>
      %46 = vector.shape_cast %45 : vector<1x1x1xf32> to vector<1x1xf32>
      %47 = vector.shape_cast %44 : vector<1x1xf32> to vector<1x1x1xf32>
      tpu.vector_store %arg3[%c0_37, %c0_38, %c2], %47 {strides = array<i32>} : memref<1x3x3xf32, #tpu.memory_space<vmem>>, vector<1x1x1xf32>,
      %c0_39 = arith.constant 0 : index
      %c0_40 = arith.constant 0 : index
      %48 = vector.load %arg7[%c0_39, %c0_40] : memref<1x128xf32, #tpu.memory_space<vmem>>, vector<1x128xf32>
      %cst_41 = arith.constant dense<0.000000e+00> : vector<1xf32>
      %49 = vector.multi_reduction <add>, %48, %cst_41 [1] : vector<1x128xf32> to vector<1xf32>
      %50 = vector.shape_cast %49 : vector<1xf32> to vector<1x1xf32>
      %c0_42 = arith.constant 0 : index
      %c1_43 = arith.constant 1 : index
      %c2_44 = arith.constant 2 : index
      %51 = vector.load %arg3[%c0_42, %c1_43, %c2_44] : memref<1x3x3xf32, #tpu.memory_space<vmem>>, vector<1x1x1xf32>
      %52 = vector.shape_cast %51 : vector<1x1x1xf32> to vector<1x1xf32>
      %53 = vector.shape_cast %50 : vector<1x1xf32> to vector<1x1x1xf32>
      tpu.vector_store %arg3[%c0_42, %c1_43, %c2_44], %53 {strides = array<i32>} : memref<1x3x3xf32, #tpu.memory_space<vmem>>, vector<1x1x1xf32>,
      %c0_45 = arith.constant 0 : index
      %c0_46 = arith.constant 0 : index
      %54 = vector.load %arg8[%c0_45, %c0_46] : memref<1x128xf32, #tpu.memory_space<vmem>>, vector<1x128xf32>
      %cst_47 = arith.constant dense<0.000000e+00> : vector<1xf32>
      %55 = vector.multi_reduction <add>, %54, %cst_47 [1] : vector<1x128xf32> to vector<1xf32>
      %56 = vector.shape_cast %55 : vector<1xf32> to vector<1x1xf32>
      %c0_48 = arith.constant 0 : index
      %c2_49 = arith.constant 2 : index
      %c2_50 = arith.constant 2 : index
      %57 = vector.load %arg3[%c0_48, %c2_49, %c2_50] : memref<1x3x3xf32, #tpu.memory_space<vmem>>, vector<1x1x1xf32>
      %58 = vector.shape_cast %57 : vector<1x1x1xf32> to vector<1x1xf32>
      %59 = vector.shape_cast %56 : vector<1x1xf32> to vector<1x1x1xf32>
      tpu.vector_store %arg3[%c0_48, %c2_49, %c2_50], %59 {strides = array<i32>} : memref<1x3x3xf32, #tpu.memory_space<vmem>>, vector<1x1x1xf32>,
    } else {
    }
    return
  }
  func.func @transform_0(%arg0: i32, %arg1: i32) -> (i32, i32, i32) {
    %c0_i32 = arith.constant 0 : i32
    %c0_i32_0 = arith.constant 0 : i32
    return %arg0, %c0_i32, %arg1 : i32, i32, i32
  }
  func.func @transform_1(%arg0: i32, %arg1: i32) -> (i32, i32, i32) {
    %c0_i32 = arith.constant 0 : i32
    %c0_i32_0 = arith.constant 0 : i32
    %c0_i32_1 = arith.constant 0 : i32
    return %arg0, %c0_i32, %c0_i32_0 : i32, i32, i32
  }
}

module attributes {stable_mosaic.version = 11 : i64} {
  func.func @_apply_kernel(%arg0: i32, %arg1: i32, %arg2: memref<6xf32, #tpu.memory_space<smem>>, %arg3: memref<1x1x3x128xf32, #tpu.memory_space<vmem>>, %arg4: memref<1x1x128xf32, #tpu.memory_space<vmem>>, %arg5: memref<1x1x128xf32, #tpu.memory_space<vmem>>) attributes {dimension_semantics = [#tpu.dimension_semantics<parallel>, #tpu.dimension_semantics<arbitrary>], iteration_bounds = array<i64: 2, 2>, scalar_prefetch = 0 : i64, scratch_operands = 0 : i64, tpu.core_type = #tpu.core_type<tc>, window_params = [{transform_indices = @transform_0, window_bounds = array<i64: 6>}, {transform_indices = @transform_1, window_bounds = array<i64: 1, 1, 3, 128>}, {transform_indices = @transform_2, window_bounds = array<i64: 1, 1, 128>}, {transform_indices = @transform_3, window_bounds = array<i64: 1, 1, 128>}]} {
    %c0 = arith.constant 0 : index
    %c0_0 = arith.constant 0 : index
    %c0_1 = arith.constant 0 : index
    %c0_2 = arith.constant 0 : index
    %0 = vector.load %arg3[%c0, %c0_0, %c0_1, %c0_2] : memref<1x1x3x128xf32, #tpu.memory_space<vmem>>, vector<1x1x3x128xf32>
    %1 = vector.shape_cast %0 : vector<1x1x3x128xf32> to vector<1x3x128xf32>
    %2 = vector.extract_strided_slice %1 {offsets = [0, 0, 0], sizes = [1, 1, 128], strides = [1, 1, 1]} : vector<1x3x128xf32> to vector<1x1x128xf32>
    %3 = vector.shape_cast %2 : vector<1x1x128xf32> to vector<1x128xf32>
    %4 = vector.extract_strided_slice %1 {offsets = [0, 1, 0], sizes = [1, 1, 128], strides = [1, 1, 1]} : vector<1x3x128xf32> to vector<1x1x128xf32>
    %5 = vector.shape_cast %4 : vector<1x1x128xf32> to vector<1x128xf32>
    %6 = vector.extract_strided_slice %1 {offsets = [0, 2, 0], sizes = [1, 1, 128], strides = [1, 1, 1]} : vector<1x3x128xf32> to vector<1x1x128xf32>
    %7 = vector.shape_cast %6 : vector<1x1x128xf32> to vector<1x128xf32>
    %c0_3 = arith.constant 0 : index
    %8 = memref.load %arg2[%c0_3] : memref<6xf32, #tpu.memory_space<smem>>
    %9 = vector.broadcast %8 : f32 to vector<1x128xf32>
    %10 = arith.mulf %9, %3 : vector<1x128xf32>
    %c1 = arith.constant 1 : index
    %11 = memref.load %arg2[%c1] : memref<6xf32, #tpu.memory_space<smem>>
    %12 = vector.broadcast %11 : f32 to vector<1x128xf32>
    %13 = arith.mulf %12, %5 : vector<1x128xf32>
    %14 = arith.addf %10, %13 : vector<1x128xf32>
    %c2 = arith.constant 2 : index
    %15 = memref.load %arg2[%c2] : memref<6xf32, #tpu.memory_space<smem>>
    %16 = vector.broadcast %15 : f32 to vector<1x128xf32>
    %17 = arith.mulf %16, %7 : vector<1x128xf32>
    %18 = arith.addf %14, %17 : vector<1x128xf32>
    %c3 = arith.constant 3 : index
    %19 = memref.load %arg2[%c3] : memref<6xf32, #tpu.memory_space<smem>>
    %20 = vector.broadcast %19 : f32 to vector<1x128xf32>
    %21 = arith.addf %18, %20 : vector<1x128xf32>
    %c4 = arith.constant 4 : index
    %22 = memref.load %arg2[%c4] : memref<6xf32, #tpu.memory_space<smem>>
    %23 = vector.broadcast %22 : f32 to vector<1x128xf32>
    %24 = arith.mulf %23, %21 : vector<1x128xf32>
    %c5 = arith.constant 5 : index
    %25 = memref.load %arg2[%c5] : memref<6xf32, #tpu.memory_space<smem>>
    %26 = vector.broadcast %25 : f32 to vector<1x128xf32>
    %27 = arith.addf %24, %26 : vector<1x128xf32>
    %cst = arith.constant 0.000000e+00 : f32
    %28 = vector.broadcast %cst : f32 to vector<1x128xf32>
    %29 = arith.cmpf oeq, %7, %28 : vector<1x128xf32>
    %cst_4 = arith.constant -1.000000e+09 : f32
    %30 = vector.broadcast %cst_4 : f32 to vector<1x128xf32>
    %31 = arith.select %29, %30, %27 : vector<1x128xi1>, vector<1x128xf32>
    %c0_5 = arith.constant 0 : index
    %c0_6 = arith.constant 0 : index
    %c0_7 = arith.constant 0 : index
    %32 = vector.load %arg4[%c0_5, %c0_6, %c0_7] : memref<1x1x128xf32, #tpu.memory_space<vmem>>, vector<1x1x128xf32>
    %33 = vector.shape_cast %32 : vector<1x1x128xf32> to vector<1x128xf32>
    %34 = vector.shape_cast %31 : vector<1x128xf32> to vector<1x1x128xf32>
    tpu.vector_store %arg4[%c0_5, %c0_6, %c0_7], %34 {strides = array<i32>} : memref<1x1x128xf32, #tpu.memory_space<vmem>>, vector<1x1x128xf32>,
    %c0_i32 = arith.constant 0 : i32
    %35 = arith.cmpi eq, %arg1, %c0_i32 : i32
    %36 = arith.extui %35 : i1 to i32
    %c0_i32_8 = arith.constant 0 : i32
    %37 = arith.cmpi ne, %36, %c0_i32_8 : i32
    scf.if %37 {
      %cst_16 = arith.constant 0xFF800000 : f32
      %49 = vector.broadcast %cst_16 : f32 to vector<1x128xf32>
      %c0_17 = arith.constant 0 : index
      %c0_18 = arith.constant 0 : index
      %c0_19 = arith.constant 0 : index
      %50 = vector.load %arg5[%c0_17, %c0_18, %c0_19] : memref<1x1x128xf32, #tpu.memory_space<vmem>>, vector<1x1x128xf32>
      %51 = vector.shape_cast %50 : vector<1x1x128xf32> to vector<1x128xf32>
      %52 = vector.shape_cast %49 : vector<1x128xf32> to vector<1x1x128xf32>
      tpu.vector_store %arg5[%c0_17, %c0_18, %c0_19], %52 {strides = array<i32>} : memref<1x1x128xf32, #tpu.memory_space<vmem>>, vector<1x1x128xf32>,
    } else {
    }
    %c0_9 = arith.constant 0 : index
    %c0_10 = arith.constant 0 : index
    %c0_11 = arith.constant 0 : index
    %38 = vector.load %arg5[%c0_9, %c0_10, %c0_11] : memref<1x1x128xf32, #tpu.memory_space<vmem>>, vector<1x1x128xf32>
    %39 = vector.shape_cast %38 : vector<1x1x128xf32> to vector<1x128xf32>
    %40 = vector.shape_cast %21 : vector<1x128xf32> to vector<1x1x128xf32>
    %cst_12 = arith.constant dense<0xFF800000> : vector<1xf32>
    %41 = vector.multi_reduction <maximumf>, %40, %cst_12 [1, 2] : vector<1x1x128xf32> to vector<1xf32>
    %42 = vector.shape_cast %41 : vector<1xf32> to vector<1x1x1xf32>
    %43 = vector.extract %42[0, 0, 0] : f32 from vector<1x1x1xf32>
    %44 = vector.broadcast %43 : f32 to vector<1x128xf32>
    %45 = arith.maximumf %39, %44 : vector<1x128xf32>
    %c0_13 = arith.constant 0 : index
    %c0_14 = arith.constant 0 : index
    %c0_15 = arith.constant 0 : index
    %46 = vector.load %arg5[%c0_13, %c0_14, %c0_15] : memref<1x1x128xf32, #tpu.memory_space<vmem>>, vector<1x1x128xf32>
    %47 = vector.shape_cast %46 : vector<1x1x128xf32> to vector<1x128xf32>
    %48 = vector.shape_cast %45 : vector<1x128xf32> to vector<1x1x128xf32>
    tpu.vector_store %arg5[%c0_13, %c0_14, %c0_15], %48 {strides = array<i32>} : memref<1x1x128xf32, #tpu.memory_space<vmem>>, vector<1x1x128xf32>,
    return
  }
  func.func @transform_0(%arg0: i32, %arg1: i32) -> i32 {
    %c0_i32 = arith.constant 0 : i32
    %c0_i32_0 = arith.constant 0 : i32
    return %c0_i32 : i32
  }
  func.func @transform_1(%arg0: i32, %arg1: i32) -> (i32, i32, i32, i32) {
    %c0_i32 = arith.constant 0 : i32
    %c0_i32_0 = arith.constant 0 : i32
    %c0_i32_1 = arith.constant 0 : i32
    return %arg0, %c0_i32, %c0_i32_0, %arg1 : i32, i32, i32, i32
  }
  func.func @transform_2(%arg0: i32, %arg1: i32) -> (i32, i32, i32) {
    %c0_i32 = arith.constant 0 : i32
    %c0_i32_0 = arith.constant 0 : i32
    return %arg0, %c0_i32, %arg1 : i32, i32, i32
  }
  func.func @transform_3(%arg0: i32, %arg1: i32) -> (i32, i32, i32) {
    %c0_i32 = arith.constant 0 : i32
    %c0_i32_0 = arith.constant 0 : i32
    %c0_i32_1 = arith.constant 0 : i32
    return %arg0, %c0_i32, %c0_i32_0 : i32, i32, i32
  }
}

module attributes {stable_mosaic.version = 11 : i64} {
  func.func @_head_kernel(%arg0: i32, %arg1: memref<1x1x256xf32, #tpu.memory_space<vmem>>, %arg2: memref<1x1x256xf32, #tpu.memory_space<vmem>>) attributes {dimension_semantics = [#tpu.dimension_semantics<parallel>], iteration_bounds = array<i64: 2>, scalar_prefetch = 0 : i64, scratch_operands = 0 : i64, tpu.core_type = #tpu.core_type<tc>, window_params = [{transform_indices = @transform_0, window_bounds = array<i64: 1, 1, 256>}, {transform_indices = @transform_1, window_bounds = array<i64: 1, 1, 256>}]} {
    %c0 = arith.constant 0 : index
    %c0_0 = arith.constant 0 : index
    %c0_1 = arith.constant 0 : index
    %0 = vector.load %arg1[%c0, %c0_0, %c0_1] : memref<1x1x256xf32, #tpu.memory_space<vmem>>, vector<1x1x256xf32>
    %1 = vector.shape_cast %0 : vector<1x1x256xf32> to vector<1x256xf32>
    %cst = arith.constant dense<0xFF800000> : vector<1xf32>
    %2 = vector.multi_reduction <maximumf>, %1, %cst [1] : vector<1x256xf32> to vector<1xf32>
    %3 = vector.shape_cast %2 : vector<1xf32> to vector<1x1xf32>
    %4 = vector.broadcast %3 : vector<1x1xf32> to vector<1x256xf32>
    %5 = arith.subf %1, %4 : vector<1x256xf32>
    %6 = math.exp %5 : vector<1x256xf32>
    %cst_2 = arith.constant dense<0.000000e+00> : vector<1xf32>
    %7 = vector.multi_reduction <add>, %6, %cst_2 [1] : vector<1x256xf32> to vector<1xf32>
    %8 = vector.shape_cast %7 : vector<1xf32> to vector<1x1xf32>
    %9 = tpu.reciprocal %8 {approx = true} : vector<1x1xf32> -> vector<1x1xf32>
    %10 = arith.mulf %8, %9 : vector<1x1xf32>
    %cst_3 = arith.constant 2.000000e+00 : f32
    %11 = vector.broadcast %cst_3 : f32 to vector<1x1xf32>
    %12 = arith.subf %11, %10 : vector<1x1xf32>
    %13 = arith.mulf %9, %12 : vector<1x1xf32>
    %14 = vector.broadcast %13 : vector<1x1xf32> to vector<1x256xf32>
    %15 = arith.mulf %6, %14 : vector<1x256xf32>
    %c0_4 = arith.constant 0 : index
    %c0_5 = arith.constant 0 : index
    %c0_6 = arith.constant 0 : index
    %16 = vector.load %arg2[%c0_4, %c0_5, %c0_6] : memref<1x1x256xf32, #tpu.memory_space<vmem>>, vector<1x1x256xf32>
    %17 = vector.shape_cast %16 : vector<1x1x256xf32> to vector<1x256xf32>
    %18 = vector.shape_cast %15 : vector<1x256xf32> to vector<1x1x256xf32>
    tpu.vector_store %arg2[%c0_4, %c0_5, %c0_6], %18 {strides = array<i32>} : memref<1x1x256xf32, #tpu.memory_space<vmem>>, vector<1x1x256xf32>,
    return
  }
  func.func @transform_0(%arg0: i32) -> (i32, i32, i32) {
    %c0_i32 = arith.constant 0 : i32
    %c0_i32_0 = arith.constant 0 : i32
    %c0_i32_1 = arith.constant 0 : i32
    return %arg0, %c0_i32, %c0_i32_0 : i32, i32, i32
  }
  func.func @transform_1(%arg0: i32) -> (i32, i32, i32) {
    %c0_i32 = arith.constant 0 : i32
    %c0_i32_0 = arith.constant 0 : i32
    %c0_i32_1 = arith.constant 0 : i32
    return %arg0, %c0_i32, %c0_i32_0 : i32, i32, i32
  }
}

</mosaic_0001>

<bundles_post_ra>
// kernel: actor_critic_forward.3
= control target key start
LH: loop header
LB: loop body
LE: loop exit
PB: predicated region body
PF: predicated region fallthrough
CT: control target
= control target key end

     0   :  { %s384_s6 = smov 0   ;;  %s386_s7 = smov 0   ;;  %s448_s0 = inlined_call_operand.vmem [shape: f32[2,3,256], index: 0, kind: input, shape index: {}]   ;;  %s449_s1 = inlined_call_operand.vmem [shape: f32[2,3,3], index: 1, kind: output, shape index: {}]  }
   0x1   :  { %s388_s8 = smov 0   ;;  %s390_s9 = smov 0  }
   0x2   :  { %s392_s10 = smov 0  }
   0x3 LB: > { %s20_s11 = sadd.s32 1, %s363_s8  ;;  %s23_s12 = sadd.s32 1, %s367_s9  ;;  %s371_s10 = sphi %s392_s10, %s11_s10   ;;  %s367_s9 = sphi %s390_s9, %s453_s9   ;;  %s363_s8 = sphi %s388_s8, %s452_s8   ;;  %s359_s7 = sphi %s386_s7, %s451_s7   ;;  %s355_s6 = sphi %s384_s6, %s450_s6  }
   0x4   : > { %p21_p0 = scmp.ge.s32.totalorder %s20_s11, 2  ;;  %p284_p1 = scmp.ge.s32.totalorder %s371_s10, 1 }
   0x5   : > { %p104_p2 = scmp.lt.s32.totalorder %s371_s10, 5 }
   0x6   : > { %s455_s11 = smov (%p21_p0, %s20_s11), 0  ;;  %s457_s12 = smov (!%p21_p0, %s23_s12), %s367_s9 }
   0x7   : > { %p105_p3 = pnand %p284_p1, %p104_p2  ;;  %p25_p4 = scmp.ge.s32.totalorder %s457_s12, 2 }
   0x8   : > { %p126_p5 = scmp.lt.s32.totalorder (!%p105_p3), %s359_s7, 1  ;;  %p128_p6 = scmp.lt.s32.totalorder (!%p105_p3), %s355_s6, 1 }
   0x9   : > { %s459_s12 = smov (%p25_p4, %s457_s12), 0  ;;  %108 = sbr.rel (%p105_p3) target bundleno = 176 (0xb0), region = 24 }
   0xa   : > { %p288_p7 = scmp.ne.s32.totalorder (!%p105_p3), %s355_s6, 0 }
   0xe   : > { %s461_s7 = smov (!%p126_p5, %s359_s7), 1 }
   0xf   : > { %s129_s13 = scalar_select %p128_p6, %s355_s6, 1 }
  0x10   : > { %s285_s14 = sshll.u32 %s461_s7, 1  ;;  %s287_s15 = sshll.u32 %s461_s7, 2 }
  0x11   : > { %s131_s16 = sadd.s32 %s285_s14, %s129_s13  ;;  %s421_s19 = scalar_lea.vmem %s449_s1, %s287_s15 }
  0x12   : > { %s286_s20 = sshll.u32 %s131_s16, 2  ;;  %141 = sbr.rel (%p288_p7) target bundleno = 29 (0x1d), region = 28 }
  0x13   : > { %s133_s23 = scalar_lea.vmem %s448_s0, %s286_s20 }
  0x17   : > { %v373_v0 = vmov 0.0  }
  0x18   : > { %142 = vst [vmem:[#allocation2] sm:$0x7] %v373_v0 }
  0x19   : > { %143 = vst [vmem:[#allocation3] sm:$0x7] %v373_v0 }
  0x1a   : > { %144 = vst [vmem:[#allocation4] sm:$0x1] %v373_v0 }
  0x1b   : > { %145 = vst [vmem:[#allocation5] sm:$0x1] %v373_v0 }
  0x1c   : > { %146 = vst [vmem:[#allocation6] sm:$0x1] %v373_v0 }
  0x1d PF: > { %v147_v1 = vld [vmem:[%s133_s23] sm:$0x7]  ;;  %p289_p8 = scmp.ne.s32.totalorder %s355_s6, 1 }
  0x1e   : > { %v157_v4 = vrot.slane %v147_v1, 1  ;;  %v152_v6 = vmul.f32 %v147_v1, %v147_v1  ;;  %v171_v7 = vrot.slane %v147_v1, 2 }
  0x1f   : > { %v148_v2 = vld [vmem:[#allocation2] sm:$0x7] }
  0x20   : > { %v151_v3 = vld [vmem:[#allocation3] sm:$0x7]  ;;  %v149_v5 = vadd.f32 %v148_v2, %v147_v1  ;;  %v159_v10 = vmul.f32 %v157_v4, %v147_v1  ;;  %v173_v12 = vmul.f32 %v171_v7, %v147_v1 }
  0x21   : > { %v155_v8 = vld [vmem:[#allocation4] sm:$0x1]  ;;  %v153_v11 = vadd.f32 %v152_v6, %v151_v3 }
  0x22   : > { %150 = vst [vmem:[#allocation2] sm:$0x7] %v149_v5  ;;  %v160_v13 = vadd.f32 %v159_v10, %v155_v8  ;;  %v162_v15 = vld [vmem:[#allocation5] sm:$0x1] }
  0x23   : > { %v170_v9 = vld [vmem:[#allocation6] sm:$0x1]  ;;  %164 = vst [vmem:[#allocation1] sm:$0xff] %v159_v10 }
  0x24   : > { %v174_v14 = vadd.f32 %v173_v12, %v170_v9  ;;  %154 = vst [vmem:[#allocation3] sm:$0x7] %v153_v11 }
  0x25   : > { %161 = vst [vmem:[#allocation4] sm:$0x1] %v160_v13 }
  0x26   : > { %175 = vst [vmem:[#allocation6] sm:$0x1] %v174_v14 }
  0x29   : > { %179 = sbr.rel (%p289_p8) target bundleno = 176 (0xb0), region = 32 }
  0x2a   : > { %v166_v16 = vld [vmem:[#allocation1 + $0x1] ss:$9 sm:$0xff] }
  0x2b   : > { %v168_v17 = vadd.f32 %v166_v16, %v162_v15 }
  0x2d   : > { %169 = vst [vmem:[#allocation5] sm:$0x1] %v168_v17 }
  0x2e   : > { %v180_v18 = vld [vmem:[#allocation2] sm:$0x7]  ;;  %vm181_vm0 = vcmask 1042432   ;;  %v193_v19 = vld [vmem:[#allocation4] sm:$0x1]  ;;  %vm194_vm1 = vcmask 1040384  }
  0x2f   : > { %v182_v20 = vsel %vm181_vm0, %v180_v18, 0.0  ;;  %v195_v21 = vsel %vm194_vm1, %v193_v19, 0.0  ;;  %v205_v22 = vld [vmem:[#allocation6] sm:$0x1]  ;;  %v187_v24 = vld [vmem:[#allocation3] sm:$0x7] }
  0x30   : > { %183 = vadd.xlane.f32.xlu0 %v182_v20  ;;  %196 = vadd.xlane.f32.xlu1 %v195_v21  ;;  %v206_v23 = vsel %vm194_vm1, %v205_v22, 0.0  ;;  %v188_v26 = vsel %vm181_vm0, %v187_v24, 0.0  ;;  %vm185_vm2 = vcmask 2048   ;;  %vm191_vm3 = vcmask 10248  }
  0x31   : > { %207 = vadd.xlane.f32.xlu2 %v206_v23  ;;  %vm198_vm4 = vcmask 16400  }
  0x34   : > { %v200_v25 = vld [vmem:[#allocation5] sm:$0x1] }
  0x35   : > { %v201_v27 = vsel %vm194_vm1, %v200_v25, 0.0 }
  0x38   : > { %189 = vadd.xlane.f32.xlu0 %v188_v26  ;;  %202 = vadd.xlane.f32.xlu1 %v201_v27 }
  0xa3   : > { %v184_v28 = vpop.xlane.xlu0 %183  ;;  %v197_v29 = vpop.xlane.xlu1 %196 }
  0xa4   : > { %186 = vst.msk [vmem:[%s421_s19] sm:$0x7] %vm185_vm2, %v184_v28  ;;  %v208_v31 = vpop.xlane.xlu2 %207 }
  0xab   : > { %v190_v30 = vpop.xlane.xlu0 %189  ;;  %v203_v32 = vpop.xlane.xlu1 %202 }
  0xac   : > { %192 = vst.msk [vmem:[%s421_s19] sm:$0x7] %vm191_vm3, %v190_v30 }
  0xad   : > { %199 = vst.msk [vmem:[%s421_s19] sm:$0x1] %vm198_vm4, %v197_v29 }
  0xae   : > { %209 = vst.msk [vmem:[%s421_s19 + $0x2] sm:$0x1] %vm198_vm4, %v208_v31 }
  0xaf   : > { %204 = vst.msk [vmem:[%s421_s19 + $0x1] sm:$0x1] %vm198_vm4, %v203_v32 }
  0xb0 PF: > { %s11_s10 = sadd.s32 1, %s371_s10   ;;  %s450_s6 = smov %s363_s8 }
  0xb1   : > { %p8_p9 = scmp.ge.s32.totalorder %s11_s10, 6   ;;  %s451_s7 = smov %s367_s9 }
  0xb2   : > { %s452_s8 = smov %s455_s11  ;;  %s453_s9 = smov %s459_s12 }
  0xb3   :  { %10 = sbr.rel (!%p8_p9) target bundleno = 3 (0x3), region = 63 }

// kernel: actor_critic_forward.4
= control target key start
LH: loop header
LB: loop body
LE: loop exit
PB: predicated region body
PF: predicated region fallthrough
CT: control target
= control target key end

     0   :  { %9 = vsyncpa [#allocation3], 0  ;;  %s547_s12 = smov 0   ;;  %s549_s13 = smov 0   ;;  %s619_s0 = inlined_call_operand.vmem [shape: f32[6], index: 0, kind: input, shape index: {}]   ;;  %s620_s1 = inlined_call_operand.vmem [shape: f32[2,1,3,256], index: 1, kind: input, shape index: {}]   ;;  %s621_s2 = inlined_call_operand.vmem [shape: f32[2,1,256], index: 2, kind: output, shape index: {0}]   ;;  %s622_s3 = inlined_call_operand.vmem [shape: f32[2,1,128], index: 3, kind: output, shape index: {1}]  }
   0x1   :  { %s551_s14 = smov 0   ;;  %s553_s15 = smov 0  }
   0x2   :  { %s555_s16 = smov 0  }
   0x3 LB: > { %s394_s17 = sadd.s32 4294967295, %s523_s16   ;;  %s24_s18 = sadd.s32 1, %s515_s14  ;;  %s523_s16 = sphi %s555_s16, %s15_s16   ;;  %s519_s15 = sphi %s553_s15, %s626_s15   ;;  %s515_s14 = sphi %s551_s14, %s625_s14   ;;  %s511_s13 = sphi %s549_s13, %s624_s13   ;;  %s507_s12 = sphi %s547_s12, %s623_s12  }
   0x4   : > { %p25_p0 = scmp.ge.s32.totalorder %s24_s18, 2  ;;  %s27_s19 = sadd.s32 1, %s519_s15 }
   0x5   : > { %p396_p1 = scmp.ge.s32.totalorder %s523_s16, 1  ;;  %p135_p2 = scmp.lt.s32.totalorder %s523_s16, 5 }
   0x6   : > { %s628_s18 = smov (%p25_p0, %s24_s18), 0  ;;  %s630_s19 = smov (!%p25_p0, %s27_s19), %s519_s15 }
   0x7   : > { %p136_p3 = pnand %p396_p1, %p135_p2  ;;  %p29_p4 = scmp.ge.s32.totalorder %s630_s19, 2 }
   0x8   : > { %p422_p5 = scmp.eq.s32.totalorder %s394_s17, 0  ;;  %s147_s22 = sshll.u32 %s619_s0, 4  ;;  %s148_s22 = int_to_ptr.vmem [resolvable:$true] %s147_s22 }
   0x9   : > { %p418_p6 = pneg %p136_p3  ;;  %s632_s19 = smov (%p29_p4, %s630_s19), 0 }
   0xa   : > { %s525_s23 = smov [#allocation2]   ;;  %171 = sbr.rel (%p136_p3) target bundleno = 232 (0xe8), region = 28 }
   0xb   : > { %p419_p7 = pnand %p422_p5, %p418_p6 }
   0xd   : > { %421 = dma.vmem_to_smem (!%p419_p7), %s148_s22, 16, %s525_s23, [#allocation3]  }
   0xf   : > { %502 = dma.done.wait (%p422_p5), [#allocation3], 16  }
  0x10   : > { %504 = vsyncadd (%p422_p5), [#allocation3], 4294967280 }
  0x11   : > { %178 = sfence }
  0x12   : > { %p205_p8 = scmp.lt.s32.totalorder %s511_s13, 1  ;;  %p207_p9 = scmp.lt.s32.totalorder %s507_s12, 1 }
  0x13   : > { %s224_s24 = sld [smem:[#allocation2]]  ;;  %p409_p10 = scmp.ne.s32.totalorder %s507_s12, 0 }
  0x14   : > { %s634_s13 = smov (!%p205_p8, %s511_s13), 1  ;;  %s404_s4 = sld [smem:[#allocation2 + $0x1]] }
  0x15   : > { %s208_s25 = scalar_select %p207_p9, %s507_s12, 1 }
  0x16   : > { %s401_s26 = sshll.u32 %s634_s13, 1  ;;  %s588_s29 = scalar_lea.vmem %s622_s3, %s634_s13 }
  0x17   : > { %s590_s30 = sadd.s32 %s401_s26, %s208_s25  ;;  %s405_s9 = sld [smem:[#allocation2 + $0x2]] }
  0x18   : > { %s402_s5 = sshll.u32 %s590_s30, 2  ;;  %s406_s10 = sld [smem:[#allocation2 + $0x3]] }
  0x19   : > { %s212_s8 = scalar_lea.vmem %s620_s1, %s402_s5  ;;  %v225_v1 = vstv %s224_s24  ;;  %s407_s11 = sld [smem:[#allocation2 + $0x4]] }
  0x1a   : > { %v223_v0 = vld [vmem:[%s212_s8] sm:$0x7]  ;;  %v228_v2 = vstv %s404_s4  ;;  %s408_s13 = sld [smem:[#allocation2 + $0x5]]  ;;  %s219_s21 = scalar_lea.vmem %s621_s2, %s590_s30 }
  0x1b   : > { %v226_v3 = vmul.f32 %v225_v1, %v223_v0  ;;  %v229_v4 = vmul.f32 %v228_v2, %v223_v0  ;;  %vm250_vm0 = vcmp.eq.f32.partialorder %v223_v0, 0.0 }
  0x1d   : > { %v235_v5 = vstv %s405_s9  ;;  %v231_v6 = vrot.slane %v229_v4, 1 }
  0x1e   : > { %v236_v7 = vmul.f32 %v235_v5, %v223_v0  ;;  %v242_v10 = vstv %s406_s10 }
  0x1f   : > { %v233_v8 = vadd.f32 %v231_v6, %v226_v3  ;;  %v245_v12 = vstv %s407_s11 }
  0x20   : > { %v238_v9 = vrot.slane %v236_v7, 2  ;;  %v248_v14 = vstv %s408_s13 }
  0x22   : > { %v240_v11 = vadd.f32 %v238_v9, %v233_v8 }
  0x24   : > { %v243_v13 = vadd.f32 %v242_v10, %v240_v11 }
  0x26   : > { %v246_v15 = vmul.f32 %v245_v12, %v243_v13 }
  0x28   : > { %v249_v16 = vadd.f32 %v248_v14, %v246_v15 }
  0x29   : > { %259 = sbr.rel (%p409_p10) target bundleno = 48 (0x30), region = 36 }
  0x2a   : > { %v252_v17 = vrot.slane %v249_v16, 6 }
  0x2c   : > { %v254_v18 = vsel %vm250_vm0, -1e+09, %v252_v17 }
  0x2d   : > { %255 = vst [vmem:[%s219_s21 - $0x2] sm:$0x4] %v254_v18 }
  0x2e   : > { %v526_v19 = vmov -inf  }
  0x2f   : > { %260 = vst [vmem:[%s588_s29] sm:$0x1] %v526_v19 }
  0x30 PF: > { %vm262_vm1 = vcmask 1040384  }
  0x31   : > { %v263_v20 = vsel %vm262_vm1, %v243_v13, -inf }
  0x32   : > { %264 = vmax.xlane.f32.xlu0 %v263_v20 }
  0x36   : > { %v261_v28 = vld [vmem:[%s588_s29] sm:$0x1] }
  0xa5   : > { %v265_v21 = vpop.xlane.xlu0 %264 }
  0xa6   : > { %v266_v22 = vrot.slane %v265_v21, 4 }
  0xa8   : > { %v267_v23 = vmax.f32 %v265_v21, %v266_v22 }
  0xaa   : > { %v268_v24 = vrot.slane %v267_v23, 2 }
  0xac   : > { %v269_v25 = vmax.f32 %v267_v23, %v268_v24 }
  0xae   : > { %v270_v26 = vrot.slane %v269_v25, 1 }
  0xb0   : > { %v271_v27 = vmax.f32 %v269_v25, %v270_v26 }
  0xb2   : > { %412 = vpush %v271_v27 }
  0xe3   : > { %s413_s12 = spop %412 }
  0xe4   : > { %v273_v29 = vstv %s413_s12 }
  0xe5   : > { %v274_v30 = vmax.f32 %v261_v28, %v273_v29 }
  0xe7   : > { %275 = vst [vmem:[%s588_s29] sm:$0x1] %v274_v30 }
  0xe8 PF: > { %s15_s16 = sadd.s32 1, %s523_s16   ;;  %s623_s12 = smov %s515_s14 }
  0xe9   : > { %p12_p11 = scmp.ge.s32.totalorder %s15_s16, 6   ;;  %s624_s13 = smov %s519_s15 }
  0xea   : > { %s625_s14 = smov %s628_s18  ;;  %s626_s15 = smov %s632_s19 }
  0xeb   :  { %14 = sbr.rel (!%p12_p11) target bundleno = 3 (0x3), region = 79 }
  0xf0   :  { %313 = vsyncpa [#allocation3], 1 }
  0xf1   :  { %315 = vsyncpa [#allocation3 + $0x1], 1 }

// kernel: actor_critic_forward.5
= control target key start
LH: loop header
LB: loop body
LE: loop exit
PB: predicated region body
PF: predicated region fallthrough
CT: control target
= control target key end

     0   :  { %s245_s6 = smov 0   ;;  %s273_s0 = inlined_call_operand.vmem [shape: f32[2,1,256], index: 0, kind: input, shape index: {}]   ;;  %s274_s1 = inlined_call_operand.vmem [shape: f32[2,1,256], index: 1, kind: output, shape index: {}]  }
   0x1 LB: > { %s206_s7 = sadd.s32 4294967295, %s233_s6   ;;  %p210_p0 = scmp.ge.s32.totalorder %s233_s6, 1  ;;  %s233_s6 = sphi %s245_s6, %s11_s6  }
   0x2   : > { %p86_p1 = scmp.lt.s32.totalorder %s233_s6, 3 }
   0x4   : > { %p87_p2 = pnand %p210_p0, %p86_p1 }
   0x5   : > { %p104_p3 = scmp.lt.s32.totalorder (!%p87_p2), %s206_s7, 1 }
   0x6   : > { %90 = sbr.rel (%p87_p2) target bundleno = 288 (0x120), region = 24 }
   0xb   : > { %s276_s7 = smov (!%p104_p3, %s206_s7), 1  ;;  %vm118_vm0 = vcmask 1040384   ;;  %v148_v20 = vlaneseq }
   0xc   : > { %s211_s8 = sshll.u32 %s276_s7, 1 }
   0xd   : > { %s107_s11 = scalar_lea.vmem %s273_s0, %s211_s8  ;;  %s111_s14 = scalar_lea.vmem %s274_s1, %s211_s8  ;;  %vm150_vm1 = vcmp.lt.s32.totalorder %v148_v20, 256 }
   0xe   : > { %v112_v0 = vld [vmem:[%s107_s11] sm:$0x3] }
   0xf   : > { %v114_v1 = vperm.slane %v112_v0, 0  ;;  %v115_v2 = vperm.slane %v112_v0, 1 }
  0x11   : > { %v119_v3 = vsel %vm118_vm0, %v114_v1, -inf  ;;  %v120_v4 = vsel %vm118_vm0, %v115_v2, -inf }
  0x12   : > { %v121_v5 = vmax.f32 %v119_v3, %v120_v4 }
  0x14   : > { %122 = vmax.xlane.f32.xlu0 %v121_v5 }
  0x87   : > { %v123_v6 = vpop.xlane.xlu0 %122 }
  0x88   : > { %v125_v7 = vperm.slane %v123_v6, 0 }
  0x8a   : > { %v127_v8 = vsub.f32 %v112_v0, %v125_v7 }
  0x8c   : > { %v128_v9 = vmul.f32 1.442695, %v127_v8 }
  0x8e   : > { %223 = vpow2.f32 %v128_v9 }
  0x94   : > { %v224_v10 = vpop.eup %223 }
  0x95   : > { %v131_v11 = vperm.slane %v224_v10, 0  ;;  %v132_v12 = vperm.slane %v224_v10, 1 }
  0x97   : > { %v135_v13 = vsel %vm118_vm0, %v131_v11, 0.0  ;;  %v136_v14 = vsel %vm118_vm0, %v132_v12, 0.0 }
  0x98   : > { %v137_v15 = vadd.f32 %v136_v14, %v135_v13 }
  0x9a   : > { %138 = vadd.xlane.f32.xlu0 %v137_v15 }
 0x10d   : > { %v139_v16 = vpop.xlane.xlu0 %138 }
 0x10e   : > { %225 = vrcp.f32 %v139_v16 }
 0x114   : > { %v226_v17 = vpop.eup %225 }
 0x115   : > { %v141_v18 = vmul.f32 %v226_v17, %v139_v16 }
 0x117   : > { %v142_v19 = vsub.f32 2.0, %v141_v18 }
 0x119   : > { %v143_v21 = vmul.f32 %v226_v17, %v142_v19 }
 0x11b   : > { %v145_v22 = vperm.slane %v143_v21, 0 }
 0x11d   : > { %v147_v23 = vmul.f32 %v224_v10, %v145_v22 }
 0x11f   : > { %152 = vst.msk [vmem:[%s111_s14] sm:$0x3] %vm150_vm1, %v147_v23 }
 0x120 PF: > { %s11_s6 = sadd.s32 1, %s233_s6  }
 0x121   : > { %p8_p4 = scmp.ge.s32.totalorder %s11_s6, 4  }
 0x123   :  { %10 = sbr.rel (!%p8_p4) target bundleno = 1 (0x1), region = 54 }

</bundles_post_ra>
